<compile_context>
chip_gen: v7x
topology: tpu7x:2x2x1
jax: 0.10.0
libtpu: 0.0.40
codegen_flags: <defaults>
</compile_context>

<pallas_src>
import functools
import math

import jax
import jax.numpy as jnp
from jax.experimental import pallas as pl
from jax.experimental.pallas import tpu as pltpu


def _round_up(a, b):
    return ((a + b - 1) // b) * b


# ---------------------------------------------------------------------------
# Kernel 1: tiled matmul + bias (+ optional fused ReLU)  == torch.addmm
# ---------------------------------------------------------------------------
def _matmul_bias_kernel(x_ref, w_ref, b_ref, o_ref, *, relu):
    acc = jnp.dot(x_ref[...], w_ref[...], preferred_element_type=jnp.float32)
    acc = acc + b_ref[...].astype(jnp.float32)          # bias add stays in f32
    if relu:
        acc = jnp.maximum(acc, 0.0)
    o_ref[...] = acc.astype(o_ref.dtype)


def linear_addmm(x, w, b, *, tm=512, relu=False, compute_dtype=None):
    """torch.addmm(b, x.view(-1, K), w).view(*size_out) as a Pallas kernel.

    `compute_dtype=jnp.bfloat16` halves x/w HBM traffic and feeds the MXU at
    its bf16 rate; accumulation and bias add remain f32, output keeps x.dtype.
    """
    orig_shape = x.shape
    out_dtype = x.dtype
    K = orig_shape[-1]
    N = w.shape[-1]
    x2d = x.reshape(-1, K)
    M = x2d.shape[0]

    if compute_dtype is not None:
        x2d = x2d.astype(compute_dtype)
        w = w.astype(compute_dtype)

    # Tile the M axis only; keep the tile a multiple of 8 (sublane) and pad the
    # rows so every grid step sees a full tile (tail handled by padding).
    tm_eff = min(tm, _round_up(M, 8))
    grid_m = pl.cdiv(M, tm_eff)
    m_pad = grid_m * tm_eff
    if m_pad != M:
        x2d = jnp.pad(x2d, ((0, m_pad - M), (0, 0)))

    b2d = b.reshape(1, N)

    itemsize = jnp.dtype(x2d.dtype).itemsize
    # double-buffered x/out tiles + resident (double-buffered) W and bias
    vmem_need = (2 * tm_eff * K * itemsize + 2 * tm_eff * N * 4
                 + 2 * K * N * itemsize + 2 * N * 4)
    vmem_limit = int(min(max(4 * vmem_need, 32 * 1024 * 1024),
                         64 * 1024 * 1024))

    cost = pl.CostEstimate(
        flops=2 * M * K * N + M * N,
        transcendentals=0,
        bytes_accessed=itemsize * (M * K + K * N) + 4 * (M * N + N),
    )

    out = pl.pallas_call(
        functools.partial(_matmul_bias_kernel, relu=relu),
        out_shape=jax.ShapeDtypeStruct((m_pad, N), out_dtype),
        grid_spec=pltpu.PrefetchScalarGridSpec(
            num_scalar_prefetch=0,
            grid=(grid_m,),
            in_specs=[
                pl.BlockSpec((tm_eff, K), lambda i: (i, 0)),
                # grid-invariant index_map: W / bias are fetched once and
                # stay resident across the M grid.
                pl.BlockSpec((K, N), lambda i: (0, 0)),
                pl.BlockSpec((1, N), lambda i: (0, 0)),
            ],
            out_specs=pl.BlockSpec((tm_eff, N), lambda i: (i, 0)),
        ),
        compiler_params=pltpu.CompilerParams(
            dimension_semantics=("parallel",),
            vmem_limit_bytes=vmem_limit,
        ),
        cost_estimate=cost,
    )(x2d, w, b2d)

    if m_pad != M:
        out = out[:M]
    return out.reshape(orig_shape[:-1] + (N,))


# ---------------------------------------------------------------------------
# Kernel 2: fused residual add + LayerNorm (epsilon inside the sqrt)
# ---------------------------------------------------------------------------
def _add_layernorm_kernel(x_ref, y_ref, g_ref, b_ref, o_ref, *, eps):
    s = x_ref[...].astype(jnp.float32) + y_ref[...].astype(jnp.float32)
    mu = jnp.mean(s, axis=-1, keepdims=True)
    c = s - mu
    var = jnp.mean(c * c, axis=-1, keepdims=True)
    norm = c * jax.lax.rsqrt(var + eps)
    o_ref[...] = (g_ref[...].astype(jnp.float32) * norm
                  + b_ref[...].astype(jnp.float32)).astype(o_ref.dtype)


def add_layernorm(x, y, g, b, *, eps=1e-5, tm=512):
    """LayerNorm(x + y) over the last dim, matching the HTV-Trans LayerNorm."""
    orig_shape = x.shape
    D = orig_shape[-1]
    x2d = x.reshape(-1, D)
    y2d = y.reshape(-1, D)
    M = x2d.shape[0]
    tm_eff = min(tm, _round_up(M, 8))
    grid_m = pl.cdiv(M, tm_eff)
    m_pad = grid_m * tm_eff
    if m_pad != M:
        x2d = jnp.pad(x2d, ((0, m_pad - M), (0, 0)))
        y2d = jnp.pad(y2d, ((0, m_pad - M), (0, 0)))
    g2d = g.reshape(1, D)
    b2d = b.reshape(1, D)

    out = pl.pallas_call(
        functools.partial(_add_layernorm_kernel, eps=eps),
        out_shape=jax.ShapeDtypeStruct((m_pad, D), x.dtype),
        grid_spec=pltpu.PrefetchScalarGridSpec(
            num_scalar_prefetch=0,
            grid=(grid_m,),
            in_specs=[
                pl.BlockSpec((tm_eff, D), lambda i: (i, 0)),
                pl.BlockSpec((tm_eff, D), lambda i: (i, 0)),
                pl.BlockSpec((1, D), lambda i: (0, 0)),
                pl.BlockSpec((1, D), lambda i: (0, 0)),
            ],
            out_specs=pl.BlockSpec((tm_eff, D), lambda i: (i, 0)),
        ),
        compiler_params=pltpu.CompilerParams(
            dimension_semantics=("parallel",)),
    )(x2d, y2d, g2d, b2d)

    if m_pad != M:
        out = out[:M]
    return out.reshape(orig_shape)


# ---------------------------------------------------------------------------
# Kernel 3: per-(batch, head) causal masked softmax attention
# ---------------------------------------------------------------------------
def _attention_kernel(q_ref, k_ref, v_ref, o_ref, *, scale):
    q = q_ref[...].astype(jnp.float32)
    k = k_ref[...].astype(jnp.float32)
    v = v_ref[...].astype(jnp.float32)
    # scores (T, T) = q @ k^T  (torch pre-transposes key; same contraction)
    s = jnp.dot(q, k.T, preferred_element_type=jnp.float32)
    if scale is not None:
        s = s * scale
    row = jax.lax.broadcasted_iota(jnp.int32, s.shape, 0)
    col = jax.lax.broadcasted_iota(jnp.int32, s.shape, 1)
    mask = (col <= row).astype(jnp.float32)               # causal tril mask
    s = s * mask + (-1e9) * (1.0 - mask)
    s = s - jnp.max(s, axis=-1, keepdims=True)
    p = jnp.exp(s)
    p = p / jnp.sum(p, axis=-1, keepdims=True)
    o_ref[...] = jnp.dot(p, v, preferred_element_type=jnp.float32
                         ).astype(o_ref.dtype)


def masked_attention(q, k, v, *, scale):
    """q, k, v: (B, H, T, P) -> (B, H, T, P)."""
    B, H, T, P = q.shape
    q2 = q.reshape(B * H, T, P)
    k2 = k.reshape(B * H, T, P)
    v2 = v.reshape(B * H, T, P)
    out = pl.pallas_call(
        functools.partial(_attention_kernel, scale=scale),
        out_shape=jax.ShapeDtypeStruct((B * H, T, P), q.dtype),
        grid_spec=pltpu.PrefetchScalarGridSpec(
            num_scalar_prefetch=0,
            grid=(B * H,),
            in_specs=[
                pl.BlockSpec((None, T, P), lambda i: (i, 0, 0)),
                pl.BlockSpec((None, T, P), lambda i: (i, 0, 0)),
                pl.BlockSpec((None, T, P), lambda i: (i, 0, 0)),
            ],
            out_specs=pl.BlockSpec((None, T, P), lambda i: (i, 0, 0)),
        ),
        compiler_params=pltpu.CompilerParams(
            dimension_semantics=("parallel",)),
    )(q2, k2, v2)
    return out.reshape(B, H, T, P)


# ---------------------------------------------------------------------------
# Glue: causal nn.Conv1d(q_len) as unfold + Pallas addmm
# ---------------------------------------------------------------------------
def causal_conv1d_proj(x, w, b, q_len):
    """nn.Conv1d(Cin, Cout, q_len) on x left-padded with (q_len-1) zeros along
    time, expressed as an unfold + matmul. x: (B, T, Cin); w: (Cout, Cin, q_len)."""
    B, T, Cin = x.shape
    xp = jnp.pad(x, ((0, 0), (q_len - 1, 0), (0, 0)))
    # (B, T, q_len*Cin) with feature layout [k, c]
    x_unf = jnp.concatenate([xp[:, k:k + T, :] for k in range(q_len)], axis=-1)
    # torch Conv1d weight (Cout, Cin, q_len): w2[k*Cin + c, o] = w[o, c, k]
    w2 = jnp.transpose(w, (2, 1, 0)).reshape(q_len * Cin, -1)
    return linear_addmm(x_unf, w2, b)


# ---------------------------------------------------------------------------
# Model
# ---------------------------------------------------------------------------
class VariationalTransformerPallas:
    """JAX/Pallas port of HTV-Trans VariationalTransformer (use_gcn=False)."""

    def __init__(self, n_time_series, n_head, num_layer, n_embd, vocab_len,
                 dropout, q_len, win_len, scale_att=False, use_gcn=False,
                 key=None):
        if use_gcn:
            # TODO(synk): use_gcn=True branch (Pooling + torch.mm(y, y.t()) GCN
            # mixing + linear_map) is not implemented.
            raise NotImplementedError("use_gcn=True path not implemented")
        if key is None:
            key = jax.random.PRNGKey(0)
        self.n_head = n_head
        self.num_layer = num_layer
        self.n_embd = n_embd
        self.q_len = q_len
        self.scale_att = scale_att
        # win_len / dropout are accepted for signature parity; the block mask
        # uses vocab_len (as in the original) and dropout is inference identity.
        d = n_time_series + n_embd            # block embedding width
        self.d_block = d
        H = n_head

        keys = jax.random.split(key, 8)
        f32 = jnp.float32
        # learnable position embedding (SelfDefinedTransformer.po_embed, std=0.02)
        self.po_embed = (0.02 * jax.random.normal(
            keys[0], (vocab_len, n_embd))).astype(f32)
        # One Block, deep-copied `num_layer` times in the original code, so all
        # layers share identical initial parameters.
        self.block = dict(
            # nn.Conv1d(d, 2*H*d, q_len): re-initialised to N(0, 0.01), bias 0
            qk_w=(0.01 * jax.random.normal(keys[1], (2 * H * d, d, q_len))
                  ).astype(f32),
            qk_b=jnp.zeros((2 * H * d,), f32),
            # Conv1D(H*d, 1, d)
            value_w=(0.02 * jax.random.normal(keys[2], (d, H * d))).astype(f32),
            value_b=jnp.zeros((H * d,), f32),
            # Conv1D(d, 1, H*d)
            cproj_w=(0.02 * jax.random.normal(keys[3], (H * d, d))).astype(f32),
            cproj_b=jnp.zeros((d,), f32),
            ln1_g=jnp.ones((d,), f32), ln1_b=jnp.zeros((d,), f32),
            # MLP: Conv1D(4d, 1, d) -> ReLU -> Conv1D(d, 1, 4d)
            fc_w=(0.02 * jax.random.normal(keys[4], (d, 4 * d))).astype(f32),
            fc_b=jnp.zeros((4 * d,), f32),
            fc2_w=(0.02 * jax.random.normal(keys[5], (4 * d, d))).astype(f32),
            fc2_b=jnp.zeros((d,), f32),
            ln2_g=jnp.ones((d,), f32), ln2_b=jnp.zeros((d,), f32),
        )

    # ------------------------------------------------------------------ block
    def _block_forward(self, x):
        p = self.block
        B, T, d = x.shape
        H = self.n_head

        # --- Attention ---
        value = linear_addmm(x, p["value_w"], p["value_b"])            # (B,T,H*d)
        qk = causal_conv1d_proj(x, p["qk_w"], p["qk_b"], self.q_len)   # (B,T,2*H*d)
        query, key = qk[..., :H * d], qk[..., H * d:]

        def split_heads(t):                                            # -> (B,H,T,d)
            return t.reshape(B, T, H, d).transpose(0, 2, 1, 3)

        scale = 1.0 / math.sqrt(d) if self.scale_att else None
        a = masked_attention(split_heads(query), split_heads(key),
                             split_heads(value), scale=scale)          # (B,H,T,d)
        a = a.transpose(0, 2, 1, 3).reshape(B, T, H * d)               # merge heads
        attn_out = linear_addmm(a, p["cproj_w"], p["cproj_b"])         # (B,T,d)
        # attn_dropout / resid_dropout: inference-mode identity.

        ln1 = add_layernorm(x, attn_out, p["ln1_g"], p["ln1_b"])

        # --- MLP (ReLU fused into the first matmul kernel) ---
        h = linear_addmm(ln1, p["fc_w"], p["fc_b"], relu=True)
        h = linear_addmm(h, p["fc2_w"], p["fc2_b"])
        return add_layernorm(ln1, h, p["ln2_g"], p["ln2_b"])

    # ---------------------------------------------------------------- forward
    def __call__(self, x, y=None):
        B, T, _ = x.shape
        pos = self.po_embed[:T]                                   # (T, n_embd)
        emb = jnp.broadcast_to(pos[None], (B, T, self.n_embd))
        h = jnp.concatenate([x, emb], axis=-1)                    # (B, T, d_block)
        for _ in range(self.num_layer):
            h = self._block_forward(h)
        return h

    # --------------------------------------------- pure-JAX reference (check)
    def reference_forward(self, x):
        p = self.block
        H, q_len = self.n_head, self.q_len
        B, T, _ = x.shape
        d = self.d_block

        def lin(t, w, b):
            return t @ w + b

        def ln(t, g, b, eps=1e-5):
            mu = t.mean(-1, keepdims=True)
            var = ((t - mu) ** 2).mean(-1, keepdims=True)
            return g * (t - mu) / jnp.sqrt(var + eps) + b

        pos = self.po_embed[:T]
        h = jnp.concatenate(
            [x, jnp.broadcast_to(pos[None], (B, T, self.n_embd))], axis=-1)
        for _ in range(self.num_layer):
            value = lin(h, p["value_w"], p["value_b"])
            xp = jnp.pad(h, ((0, 0), (q_len - 1, 0), (0, 0)))
            x_unf = jnp.concatenate([xp[:, k:k + T, :] for k in range(q_len)], -1)
            w2 = jnp.transpose(p["qk_w"], (2, 1, 0)).reshape(q_len * d, -1)
            qk = lin(x_unf, w2, p["qk_b"])
            query, key = qk[..., :H * d], qk[..., H * d:]
            sh = lambda t: t.reshape(B, T, H, d).transpose(0, 2, 1, 3)
            q_, k_, v_ = sh(query), sh(key), sh(value)
            s = jnp.einsum("bhqd,bhkd->bhqk", q_, k_)
            if self.scale_att:
                s = s / math.sqrt(d)
            mask = jnp.tril(jnp.ones((T, T), jnp.float32))
            s = s * mask + (-1e9) * (1.0 - mask)
            a = jax.nn.softmax(s, axis=-1)
            a = jnp.einsum("bhqk,bhkd->bhqd", a, v_)
            a = a.transpose(0, 2, 1, 3).reshape(B, T, H * d)
            attn_out = lin(a, p["cproj_w"], p["cproj_b"])
            ln1 = ln(h + attn_out, p["ln1_g"], p["ln1_b"])
            m = jnp.maximum(lin(ln1, p["fc_w"], p["fc_b"]), 0.0)
            m = lin(m, p["fc2_w"], p["fc2_b"])
            h = ln(ln1 + m, p["ln2_g"], p["ln2_b"])
        return h


if __name__ == "__main__":
    key = jax.random.PRNGKey(0)

    # Small shapes consistent with the module: block width d = 8 + 24 = 32,
    # per-head dim 32, fused q/k projection width 2*H*d = 128 (lane-dense),
    # MLP hidden 4*d = 128 (lane-dense).
    n_time_series, n_embd, n_head = 8, 24, 2
    num_layer, vocab_len, q_len, win_len = 2, 16, 2, 16
    batch, seq_len = 2, 8

    model = VariationalTransformerPallas(
        n_time_series, n_head, num_layer, n_embd, vocab_len,
        dropout=0.1, q_len=q_len, win_len=win_len, scale_att=True,
        use_gcn=False, key=key)

    x = jax.random.normal(jax.random.fold_in(key, 123),
                          (batch, seq_len, n_time_series), dtype=jnp.float32)

    out = jax.block_until_ready(model(x))
    assert out.shape == (batch, seq_len, n_time_series + n_embd)

    ref = jax.block_until_ready(model.reference_forward(x))
    max_err = float(jnp.max(jnp.abs(out - ref)))
    assert jnp.allclose(out, ref, atol=2e-3, rtol=2e-3), max_err

    # bf16-input fast path of the addmm kernel (halves HBM traffic; f32 accum).
    w = model.block["fc_w"]
    b = model.block["fc_b"]
    h = jax.random.normal(jax.random.fold_in(key, 7),
                          (batch, seq_len, w.shape[0]), dtype=jnp.float32)
    y_bf16 = jax.block_until_ready(
        linear_addmm(h, w, b, compute_dtype=jnp.bfloat16))
    y_f32 = h.reshape(-1, w.shape[0]) @ w + b
    assert jnp.allclose(y_bf16.reshape(-1, w.shape[-1]), y_f32,
                        atol=3e-2, rtol=3e-2)

    print("KERNEL_OK")
</pallas_src>

<mosaic_0001>
module attributes {stable_mosaic.version = 11 : i64} {
  func.func @_matmul_bias_kernel(%arg0: i32, %arg1: memref<16x32xf32, #tpu.memory_space<vmem>>, %arg2: memref<32x64xf32, #tpu.memory_space<vmem>>, %arg3: memref<1x64xf32, #tpu.memory_space<vmem>>, %arg4: memref<16x64xf32, #tpu.memory_space<vmem>>) attributes {dimension_semantics = [#tpu.dimension_semantics<parallel>], iteration_bounds = array<i64: 1>, scalar_prefetch = 0 : i64, scratch_operands = 0 : i64, tpu.core_type = #tpu.core_type<tc>, window_params = [{transform_indices = @transform_0, window_bounds = array<i64: 16, 32>}, {pipeline_mode = #tpu.pipeline_mode<synchronous>, transform_indices = @transform_1, window_bounds = array<i64: 32, 64>}, {pipeline_mode = #tpu.pipeline_mode<synchronous>, transform_indices = @transform_2, window_bounds = array<i64: 1, 64>}, {transform_indices = @transform_3, window_bounds = array<i64: 16, 64>}]} {
    %c0 = arith.constant 0 : index
    %c0_0 = arith.constant 0 : index
    %0 = vector.load %arg1[%c0, %c0_0] : memref<16x32xf32, #tpu.memory_space<vmem>>, vector<16x32xf32>
    %c0_1 = arith.constant 0 : index
    %c0_2 = arith.constant 0 : index
    %1 = vector.load %arg2[%c0_1, %c0_2] : memref<32x64xf32, #tpu.memory_space<vmem>>, vector<32x64xf32>
    %cst = arith.constant dense<0.000000e+00> : vector<16x64xf32>
    %2 = tpu.matmul %0, %1, %cst {dimension_numbers = #tpu.dot_dimension_numbers<[1], [0], [0], [1], [0, 0, 1, 1], [], []>} : vector<16x32xf32>, vector<32x64xf32>, vector<16x64xf32> -> vector<16x64xf32>
    %c0_3 = arith.constant 0 : index
    %c0_4 = arith.constant 0 : index
    %3 = vector.load %arg3[%c0_3, %c0_4] : memref<1x64xf32, #tpu.memory_space<vmem>>, vector<1x64xf32>
    %4 = vector.broadcast %3 : vector<1x64xf32> to vector<16x64xf32>
    %5 = arith.addf %2, %4 : vector<16x64xf32>
    %c0_5 = arith.constant 0 : index
    %c0_6 = arith.constant 0 : index
    %6 = vector.load %arg4[%c0_5, %c0_6] : memref<16x64xf32, #tpu.memory_space<vmem>>, vector<16x64xf32>
    tpu.vector_store %arg4[%c0_5, %c0_6], %5 {strides = array<i32>} : memref<16x64xf32, #tpu.memory_space<vmem>>, vector<16x64xf32>,
    return
  }
  func.func @transform_0(%arg0: i32) -> (i32, i32) {
    %c0_i32 = arith.constant 0 : i32
    %c0_i32_0 = arith.constant 0 : i32
    return %arg0, %c0_i32 : i32, i32
  }
  func.func @transform_1(%arg0: i32) -> (i32, i32) {
    %c0_i32 = arith.constant 0 : i32
    %c0_i32_0 = arith.constant 0 : i32
    %c0_i32_1 = arith.constant 0 : i32
    return %c0_i32, %c0_i32_0 : i32, i32
  }
  func.func @transform_2(%arg0: i32) -> (i32, i32) {
    %c0_i32 = arith.constant 0 : i32
    %c0_i32_0 = arith.constant 0 : i32
    %c0_i32_1 = arith.constant 0 : i32
    return %c0_i32, %c0_i32_0 : i32, i32
  }
  func.func @transform_3(%arg0: i32) -> (i32, i32) {
    %c0_i32 = arith.constant 0 : i32
    %c0_i32_0 = arith.constant 0 : i32
    return %arg0, %c0_i32 : i32, i32
  }
}

</mosaic_0001>

<bundles_post_ra>
// kernel: tpu_custom_call.1
= control target key start
LH: loop header
LB: loop body
LE: loop exit
PB: predicated region body
PF: predicated region fallthrough
CT: control target
= control target key end

     0   :  { %8 = vsyncpa [#allocation3], 0  ;;  %s337_s0 = inlined_call_operand.hbm [shape: f32[16,32], index: 0, kind: input, shape index: {}]   ;;  %s338_s1 = inlined_call_operand.hbm [shape: f32[32,64], index: 1, kind: input, shape index: {}]   ;;  %s339_s2 = inlined_call_operand.vmem [shape: f32[1,64], index: 2, kind: input, shape index: {}]   ;;  %s340_s3 = inlined_call_operand.hbm [shape: f32[16,64], index: 3, kind: output, shape index: {}]  }
   0x1   :  { %9 = vsyncpa [#allocation6], 0 }
   0x2   :  { %10 = vsyncpa [#allocation4], 0  ;;  %s264_s12 = smov [#allocation2]   ;;  %s192_s16 = scalar_lea.hbm %s337_s0, 256 }
   0x3   :  { %s16_s13 = sshll.u32 %s264_s12, 4  ;;  %p193_p0 = scmp.ne.s32.totalorder %s337_s0, %s192_s16  ;;  %s17_s13 = int_to_ptr.vmem [resolvable:$true] %s16_s13 }
   0x4   :  { %p196_p1 = scmp.lt.u32.totalorder %s192_s16, %s337_s0 }
   0x6   :  { %p198_p2 = pnand %p196_p1, %p193_p0 }
   0x8   :  { %201 = shalt.err (!%p198_p2)
}
   0x9   :  { %s202_s21 = scalar_lea.vmem %s17_s13, 256  ;;  %p207_p4 = scmp.lt.s32.totalorder %s17_s13, %s17_s13 }
   0xa   :  { %p203_p3 = scmp.ne.s32.totalorder %s17_s13, %s202_s21  ;;  %p208_p5 = scmp.lt.s32.totalorder %s202_s21, %s202_s21 }
   0xc   :  { %p209_p6 = por %p208_p5, %p207_p4 }
   0xe   :  { %p210_p7 = pnand %p209_p6, %p203_p3 }
  0x10   :  { %213 = shalt.err (!%p210_p7)
}
  0x11   :  { %s265_s22 = smov 128   ;;  %s266_s23 = smov 8  }
  0x12   :  { %22 = dma.hbm_to_vmem [thread:$0]  %s337_s0, 256, %s17_s13, [#allocation3], %s265_s22, %s265_s22, %s266_s23  }
  0x13   :  { %s267_s26 = smov [#allocation5]   ;;  %s214_s30 = scalar_lea.hbm %s338_s1, 512 }
  0x14   :  { %s28_s27 = sshll.u32 %s267_s26, 4  ;;  %p215_p8 = scmp.ne.s32.totalorder %s338_s1, %s214_s30  ;;  %s29_s27 = int_to_ptr.vmem [resolvable:$true] %s28_s27 }
  0x15   :  { %p218_p9 = scmp.lt.u32.totalorder %s214_s30, %s338_s1 }
  0x17   :  { %p220_p10 = pnand %p218_p9, %p215_p8 }
  0x19   :  { %223 = shalt.err (!%p220_p10)
}
  0x1a   :  { %s224_s8 = scalar_lea.vmem %s29_s27, 512  ;;  %p229_p12 = scmp.lt.s32.totalorder %s29_s27, %s29_s27 }
  0x1b   :  { %p225_p11 = scmp.ne.s32.totalorder %s29_s27, %s224_s8  ;;  %p230_p13 = scmp.lt.s32.totalorder %s224_s8, %s224_s8 }
  0x1d   :  { %p231_p0 = por %p230_p13, %p229_p12 }
  0x1f   :  { %p232_p1 = pnand %p231_p0, %p225_p11 }
  0x21   :  { %235 = shalt.err (!%p232_p1)
}
  0x22   :  { %34 = dma.hbm_to_vmem [thread:$0]  %s338_s1, 512, %s29_s27, [#allocation6], %s265_s22, %s265_s22, %s266_s23  }
  0x23   :  { %258 = dma.done.wait [#allocation3], 256  }
  0x24   :  { %259 = vsyncadd [#allocation3], 4294967040 }
  0x25   :  { %260 = dma.done.wait [#allocation6], 512  }
  0x26   :  { %261 = vsyncadd [#allocation6], 4294966784  ;;  %vm56_vm0 = vcmask 261120   ;;  %v45_v0 = vld [vmem:[#allocation5] sm:$0xff]  ;;  %v46_v1 = vld [vmem:[#allocation5 + $0x8] sm:$0xff]  ;;  %s268_s11 = smov [#allocation7]  }
  0x27   :  { %v47_v2 = vld [vmem:[#allocation5 + $0x10] sm:$0xff]  ;;  %v179_v3 = vpack.c.bf16 %v46_v1, %v45_v0  ;;  %v48_v4 = vld [vmem:[#allocation5 + $0x18] sm:$0xff]  ;;  %s146_s12 = sshll.u32 %s268_s11, 4  ;;  %vm138_vm1 = vcmask 523264   ;;  %s147_s12 = int_to_ptr.vmem [resolvable:$true] %s146_s12 }
  0x28   :  { %v43_v5 = vld [vmem:[#allocation2] sm:$0xff]  ;;  %v183_v6 = vpack.c.bf16 %v48_v4, %v47_v2  ;;  %v44_v7 = vld [vmem:[#allocation2 + $0x8] sm:$0xff]  ;;  %s236_s13 = scalar_lea.vmem %s147_s12, 256  ;;  %p241_p3 = scmp.lt.s32.totalorder %s147_s12, %s147_s12 }
  0x29   :  { %176 = vmatprep.mubr.msk.f32.mxu0 %vm56_vm0, %v43_v5  ;;  %180 = vmatprep.subr.bf16.mxu0 %v179_v3  ;;  %v159_v8 = vld [vmem:[%s339_s2] ss:$0 sm:$0xff]  ;;  %p237_p2 = scmp.ne.s32.totalorder %s147_s12, %s236_s13  ;;  %p242_p4 = scmp.lt.s32.totalorder %s236_s13, %s236_s13 }
  0x2a   :  { %182 = vmatpush3.bf16.msra.mxu0 %v179_v3 }
  0x2b   :  { %184 = vmatprep.subr.bf16.mxu0 %v183_v6  ;;  %p243_p5 = por %p242_p4, %p241_p3 }
  0x2d   :  { %p244_p6 = pnand %p243_p5, %p237_p2 }
  0x2e   :  { %186 = vmatpush3.bf16.msra.mxu0 %v183_v6 }
  0x31   :  { %177 = vmatmul.mubr.msk.f32.vlgmr.msra.gmra.mrb[0].mxu0 %vm56_vm0, %v44_v7 }
 0x104   :  { %v178_v9 = vpop.f32.mrb[0].mxu0 }
 0x105   :  { %v135_v10 = vadd.f32 %v178_v9, %v159_v8  ;;  %v129_v11 = vpop.f32.mrb[1].mxu0 }
 0x106   :  { %v130_v12 = vadd.f32 %v159_v8, %v129_v11 }
 0x107   :  { %140 = vst.msk [vmem:[#allocation7 + $0x8] sm:$0xff] %vm138_vm1, %v135_v10 }
 0x108   :  { %139 = vst.msk [vmem:[#allocation7] sm:$0xff] %vm138_vm1, %v130_v12 }
 0x109   :  { %247 = shalt.err (!%p244_p6)
}
 0x10a   :  { %s248_s2 = scalar_lea.hbm %s340_s3, 256 }
 0x10b   :  { %p249_p7 = scmp.ne.s32.totalorder %s340_s3, %s248_s2  ;;  %p252_p8 = scmp.lt.u32.totalorder %s248_s2, %s340_s3 }
 0x10d   :  { %p254_p9 = pnand %p252_p8, %p249_p7 }
 0x10f   :  { %257 = shalt.err (!%p254_p9)
}
 0x110   :  { %152 = dma.vmem_to_hbm [thread:$0]  %s147_s12, 256, %s340_s3, [#allocation4], %s265_s22, %s265_s22, %s266_s23  }
 0x111   :  { %262 = dma.done.wait [#allocation4], 256  }
 0x112   :  { %263 = vsyncadd [#allocation4], 4294967040 }
 0x113   :  { %156 = vsyncpa [#allocation3], 1 }
 0x114   :  { %157 = vsyncpa [#allocation6], 1 }
 0x115   :  { %158 = vsyncpa [#allocation4], 1 }

</bundles_post_ra>
